<compile_context>
chip_gen: v7x
topology: tpu7x:2x2x1
jax: 0.10.0
libtpu: 0.0.40
codegen_flags: <defaults>
</compile_context>

<pallas_src>
import functools

import numpy as np
import jax
import jax.numpy as jnp
from jax.experimental import pallas as pl
from jax.experimental.pallas import tpu as pltpu


_LANES = 128                    # vreg lane width
_SUBLANES = 8                   # vreg sublane height (table slab rows)
_MAX_BATCH_TILE = 2048          # hard cap on batch lanes per grid step
_ONEHOT_VMEM_BUDGET = 4 << 20   # bytes allowed for the (n_pad, tb) f32 one-hot


def cosine_beta_schedule_discrete(timesteps, s=0.008):
    """Cosine schedule (DiGress diffusion_utils.cosine_beta_schedule_discrete)."""
    steps = timesteps + 2
    x = np.linspace(0, steps, steps)
    alphas_cumprod = np.cos(0.5 * np.pi * ((x / steps) + s) / (1 + s)) ** 2
    alphas_cumprod = alphas_cumprod / alphas_cumprod[0]
    alphas = alphas_cumprod[1:] / alphas_cumprod[:-1]
    betas = 1 - alphas
    return betas.squeeze()  # shape (timesteps + 1,)


def _round_up(x, m):
    return ((x + m - 1) // m) * m


def _batch_tiling(batch, n_pad):
    """Bucket batch to a lane-aligned size and pick a VMEM-budgeted batch tile."""
    b_aligned = _round_up(max(batch, 1), _LANES)
    # Keep the compiler-materialized (n_pad, tb) f32 one-hot under the budget;
    # comfortable on v5e/v6e (128 MiB VMEM) and v7x (64 MiB, 32 MiB scoped).
    tb_budget = (_ONEHOT_VMEM_BUDGET // (4 * n_pad)) // _LANES * _LANES
    tb = int(min(b_aligned, max(_LANES, tb_budget), _MAX_BATCH_TILE))
    b_pad = _round_up(b_aligned, tb)
    return b_pad, tb


@functools.lru_cache(maxsize=None)
def _build_lookup_fn(timesteps, n_pad, b_pad, tb, scale_t):
    """Build (once per bucket) a jitted lookup.

    Returns a function (t_pad(1, b_pad) f32, table(8, n_pad) f32) -> (8, b_pad)
    f32 slab equal to table[:, clip(idx, 0, timesteps)] with
    idx = round(t * timesteps) if scale_t else trunc(t)  (== torch .long()).
    """
    n_tiles = b_pad // tb

    def kernel(t_ref, tab_ref, out_ref):
        t = t_ref[...]                                        # (1, tb) f32, batch on lanes
        if scale_t:
            idx = jnp.round(t * jnp.float32(timesteps)).astype(jnp.int32)
        else:
            idx = t.astype(jnp.int32)                         # truncation, matches .long()
        idx = jnp.clip(idx, 0, timesteps)                     # (1, tb) i32
        # One-hot over the table axis (sublane-major), batch along lanes.
        sub_ids = jax.lax.broadcasted_iota(jnp.int32, (n_pad, tb), 0)
        onehot = (sub_ids == idx).astype(jnp.float32)         # (n_pad, tb)
        # Gather via MXU: (8, n_pad) @ (n_pad, tb) -> (8, tb), lane-dense,
        # exact f32 (one-hot selection; HIGHEST avoids bf16-pass rounding).
        out_ref[...] = jnp.dot(
            tab_ref[...], onehot,
            preferred_element_type=jnp.float32,
            precision=jax.lax.Precision.HIGHEST,
        )

    call = pl.pallas_call(
        kernel,
        out_shape=jax.ShapeDtypeStruct((_SUBLANES, b_pad), jnp.float32),
        grid=(n_tiles,),
        in_specs=[
            pl.BlockSpec((1, tb), lambda i: (0, i)),             # t (batch on lanes)
            pl.BlockSpec((_SUBLANES, n_pad), lambda i: (0, 0)),  # fused tables (invariant)
        ],
        out_specs=pl.BlockSpec((_SUBLANES, tb), lambda i: (0, i)),
        compiler_params=pltpu.CompilerParams(
            dimension_semantics=("parallel",),   # batch tiles independent (v7x 2 TCs)
        ),
    )
    return jax.jit(call)


class PredefinedNoiseScheduleDiscrete:
    """JAX/Pallas port of the PyTorch module (forward + get_alpha_bar)."""

    _ROW_BETAS = 0
    _ROW_ALPHAS = 1
    _ROW_ALPHAS_BAR = 2

    def __init__(self, noise_schedule, timesteps):
        self.timesteps = timesteps
        if noise_schedule == "cosine":
            betas = cosine_beta_schedule_discrete(timesteps)
        else:
            # TODO(synk): 'custom' schedule from diffusion_utils not ported.
            raise NotImplementedError(noise_schedule)

        betas = np.asarray(betas, dtype=np.float32)              # (T+1,)
        alphas = (1.0 - np.clip(betas, 0.0, 0.9999)).astype(np.float32)
        log_alpha_bar = np.cumsum(np.log(alphas), axis=0)
        alphas_bar = np.exp(log_alpha_bar).astype(np.float32)

        # 1-D buffers (for reference / external use).
        self.betas = jnp.asarray(betas)
        self.alphas = jnp.asarray(alphas)
        self.alphas_bar = jnp.asarray(alphas_bar)

        # Fused, zero-padded lookup table: rows = {betas, alphas, alphas_bar},
        # table index along lanes, padded to (8, next multiple of 128).
        n = betas.shape[0]                                       # timesteps + 1
        n_pad = _round_up(n, _LANES)
        table = np.zeros((_SUBLANES, n_pad), dtype=np.float32)
        table[self._ROW_BETAS, :n] = betas
        table[self._ROW_ALPHAS, :n] = alphas
        table[self._ROW_ALPHAS_BAR, :n] = alphas_bar
        self._n_pad = n_pad
        self._table = jnp.asarray(table)                         # (8, n_pad)

    # ---- internal ---------------------------------------------------------
    def _lookup_slab(self, t, scale_t):
        """One kernel launch -> full (8, b_pad) slab of {betas, alphas, alphas_bar}."""
        t = jnp.asarray(t, jnp.float32)
        shape = t.shape
        flat = t.reshape(1, -1)                                  # (1, B) batch on lanes
        batch = flat.shape[1]
        b_pad, tb = _batch_tiling(batch, self._n_pad)
        fn = _build_lookup_fn(self.timesteps, self._n_pad, b_pad, tb, scale_t)
        flat = jnp.pad(flat, ((0, 0), (0, b_pad - batch)))       # outside cached jit
        slab = fn(flat, self._table)                             # (8, b_pad)
        return slab, batch, shape

    def _lookup(self, t, row, scale_t):
        slab, batch, shape = self._lookup_slab(t, scale_t)
        return slab[row, :batch].reshape(shape)

    # ---- public API (mirrors the PyTorch module) --------------------------
    def __call__(self, t_normalized=None, t_int=None):
        assert int(t_normalized is None) + int(t_int is None) == 1
        if t_int is None:
            return self._lookup(t_normalized, self._ROW_BETAS, True)
        return self._lookup(t_int, self._ROW_BETAS, False)

    forward = __call__

    def get_alpha_bar(self, t_normalized=None, t_int=None):
        assert int(t_normalized is None) + int(t_int is None) == 1
        if t_int is None:
            return self._lookup(t_normalized, self._ROW_ALPHAS_BAR, True)
        return self._lookup(t_int, self._ROW_ALPHAS_BAR, False)

    def get_betas_and_alpha_bar(self, t_normalized=None, t_int=None):
        """Both betas[t] and alphas_bar[t] from a single kernel launch."""
        assert int(t_normalized is None) + int(t_int is None) == 1
        t = t_normalized if t_int is None else t_int
        slab, batch, shape = self._lookup_slab(t, t_int is None)
        return (slab[self._ROW_BETAS, :batch].reshape(shape),
                slab[self._ROW_ALPHAS_BAR, :batch].reshape(shape))


if __name__ == "__main__":
    timesteps = 8
    batch = 2

    sched = PredefinedNoiseScheduleDiscrete("cosine", timesteps)

    key = jax.random.PRNGKey(0)
    # t_normalized in [0, 1), shape (batch, 1) as used in DiGress.
    t_normalized = jax.random.uniform(key, (batch, 1), dtype=jnp.float32)
    t_idx = jnp.round(t_normalized * timesteps).astype(jnp.int32)

    # forward: betas[round(t * T)]
    out = jax.block_until_ready(sched(t_normalized=t_normalized))
    ref = sched.betas[t_idx.reshape(-1)].reshape(batch, 1)
    assert out.shape == (batch, 1) and out.dtype == jnp.float32
    np.testing.assert_allclose(np.asarray(out), np.asarray(ref), rtol=1e-6, atol=1e-6)

    # forward with t_int (float-cast integer values, incl. edge indices)
    t_int = jnp.array([[0.0], [float(timesteps)]], dtype=jnp.float32)
    out2 = jax.block_until_ready(sched(t_int=t_int))
    ref2 = sched.betas[t_int.astype(jnp.int32).reshape(-1)].reshape(batch, 1)
    np.testing.assert_allclose(np.asarray(out2), np.asarray(ref2), rtol=1e-6, atol=1e-6)

    # get_alpha_bar
    ab = jax.block_until_ready(sched.get_alpha_bar(t_normalized=t_normalized))
    ab_ref = sched.alphas_bar[t_idx.reshape(-1)].reshape(batch, 1)
    np.testing.assert_allclose(np.asarray(ab), np.asarray(ab_ref), rtol=1e-6, atol=1e-6)

    # Single-launch combined lookup (betas + alphas_bar from one kernel call).
    b_both, ab_both = sched.get_betas_and_alpha_bar(t_normalized=t_normalized)
    jax.block_until_ready((b_both, ab_both))
    np.testing.assert_allclose(np.asarray(b_both), np.asarray(ref), rtol=1e-6, atol=1e-6)
    np.testing.assert_allclose(np.asarray(ab_both), np.asarray(ab_ref), rtol=1e-6, atol=1e-6)

    # Different batch size in the same 128-lane bucket -> no new compile
    # (cache is keyed on b_pad/tb/scale_t, not exact batch, and not on row).
    t3 = jax.random.uniform(jax.random.PRNGKey(1), (3, 1), dtype=jnp.float32)
    out3 = jax.block_until_ready(sched(t_normalized=t3))
    ref3 = sched.betas[jnp.round(t3 * timesteps).astype(jnp.int32).reshape(-1)].reshape(3, 1)
    np.testing.assert_allclose(np.asarray(out3), np.asarray(ref3), rtol=1e-6, atol=1e-6)
    # Only two kernel variants were built: scale_t=True and scale_t=False.
    assert _build_lookup_fn.cache_info().misses <= 2, _build_lookup_fn.cache_info()

    print("KERNEL_OK")
</pallas_src>

<mosaic_0001>
module attributes {stable_mosaic.version = 11 : i64} {
  func.func @kernel(%arg0: i32, %arg1: memref<1x128xf32, #tpu.memory_space<vmem>>, %arg2: memref<8x128xf32, #tpu.memory_space<vmem>>, %arg3: memref<8x128xf32, #tpu.memory_space<vmem>>) attributes {dimension_semantics = [#tpu.dimension_semantics<parallel>], iteration_bounds = array<i64: 1>, scalar_prefetch = 0 : i64, scratch_operands = 0 : i64, tpu.core_type = #tpu.core_type<tc>, window_params = [{transform_indices = @transform_0, window_bounds = array<i64: 1, 128>}, {pipeline_mode = #tpu.pipeline_mode<synchronous>, transform_indices = @transform_1, window_bounds = array<i64: 8, 128>}, {transform_indices = @transform_2, window_bounds = array<i64: 8, 128>}]} {
    %c0 = arith.constant 0 : index
    %c0_0 = arith.constant 0 : index
    %0 = vector.load %arg1[%c0, %c0_0] : memref<1x128xf32, #tpu.memory_space<vmem>>, vector<1x128xf32>
    %cst = arith.constant 8.000000e+00 : f32
    %1 = vector.broadcast %cst : f32 to vector<1x128xf32>
    %2 = arith.mulf %0, %1 : vector<1x128xf32>
    %3 = math.roundeven %2 : vector<1x128xf32>
    %4 = arith.fptosi %3 : vector<1x128xf32> to vector<1x128xi32>
    %c0_i32 = arith.constant 0 : i32
    %c8_i32 = arith.constant 8 : i32
    %5 = vector.broadcast %c0_i32 : i32 to vector<1x128xi32>
    %6 = arith.maxsi %5, %4 : vector<1x128xi32>
    %7 = vector.broadcast %c8_i32 : i32 to vector<1x128xi32>
    %8 = arith.minsi %7, %6 : vector<1x128xi32>
    %9 = tpu.iota {dimensions = array<i32: 0>} : vector<128x128xi32>
    %10 = vector.broadcast %8 : vector<1x128xi32> to vector<128x128xi32>
    %11 = arith.cmpi eq, %9, %10 : vector<128x128xi32>
    %12 = arith.extui %11 : vector<128x128xi1> to vector<128x128xi32>
    %13 = arith.sitofp %12 : vector<128x128xi32> to vector<128x128xf32>
    %c0_1 = arith.constant 0 : index
    %c0_2 = arith.constant 0 : index
    %14 = vector.load %arg2[%c0_1, %c0_2] : memref<8x128xf32, #tpu.memory_space<vmem>>, vector<8x128xf32>
    %cst_3 = arith.constant dense<0.000000e+00> : vector<8x128xf32>
    %15 = tpu.matmul %14, %13, %cst_3 {dimension_numbers = #tpu.dot_dimension_numbers<[1], [0], [0], [1], [0, 0, 1, 1], [], []>, precision = #tpu.contract_precision<fp32>} : vector<8x128xf32>, vector<128x128xf32>, vector<8x128xf32> -> vector<8x128xf32>
    %c0_4 = arith.constant 0 : index
    %c0_5 = arith.constant 0 : index
    %16 = vector.load %arg3[%c0_4, %c0_5] : memref<8x128xf32, #tpu.memory_space<vmem>>, vector<8x128xf32>
    tpu.vector_store %arg3[%c0_4, %c0_5], %15 {strides = array<i32>} : memref<8x128xf32, #tpu.memory_space<vmem>>, vector<8x128xf32>,
    return
  }
  func.func @transform_0(%arg0: i32) -> (i32, i32) {
    %c0_i32 = arith.constant 0 : i32
    %c0_i32_0 = arith.constant 0 : i32
    return %c0_i32, %arg0 : i32, i32
  }
  func.func @transform_1(%arg0: i32) -> (i32, i32) {
    %c0_i32 = arith.constant 0 : i32
    %c0_i32_0 = arith.constant 0 : i32
    %c0_i32_1 = arith.constant 0 : i32
    return %c0_i32, %c0_i32_0 : i32, i32
  }
  func.func @transform_2(%arg0: i32) -> (i32, i32) {
    %c0_i32 = arith.constant 0 : i32
    %c0_i32_0 = arith.constant 0 : i32
    return %c0_i32, %arg0 : i32, i32
  }
}

</mosaic_0001>

<bundles_post_ra>
// kernel: tpu_custom_call.1
= control target key start
LH: loop header
LB: loop body
LE: loop exit
PB: predicated region body
PF: predicated region fallthrough
CT: control target
= control target key end

     0   :  { %7 = vsyncpa [#allocation3], 0  ;;  %s1858_s0 = inlined_call_operand.hbm [shape: f32[1,128], index: 0, kind: input, shape index: {}]   ;;  %s1859_s1 = inlined_call_operand.hbm [shape: f32[8,128], index: 1, kind: input, shape index: {}]   ;;  %s1860_s2 = inlined_call_operand.hbm [shape: f32[8,128], index: 2, kind: output, shape index: {}]  }
   0x1   :  { %8 = vsyncpa [#allocation6], 0 }
   0x2   :  { %9 = vsyncpa [#allocation4], 0  ;;  %s1382_s9 = smov [#allocation2]   ;;  %s1383_s11 = smov [#allocation5]  }
   0x3   :  { %s16_s10 = sshll.u32 %s1382_s9, 4  ;;  %s26_s12 = sshll.u32 %s1383_s11, 4  ;;  %s17_s10 = int_to_ptr.vmem [resolvable:$true] %s16_s10  ;;  %s27_s12 = int_to_ptr.vmem [resolvable:$true] %s26_s12 }
   0x4   :  { %s1310_s15 = scalar_lea.hbm %s1858_s0, 16 }
   0x5   :  { %p1311_p0 = scmp.ne.s32.totalorder %s1858_s0, %s1310_s15  ;;  %p1314_p1 = scmp.lt.u32.totalorder %s1310_s15, %s1858_s0 }
   0x7   :  { %p1316_p2 = pnand %p1314_p1, %p1311_p0 }
   0x9   :  { %1319 = shalt.err (!%p1316_p2)
}
   0xa   :  { %s1320_s20 = scalar_lea.vmem %s17_s10, 16  ;;  %s1324_s21 = scalar_lea.vmem %s17_s10, 32 }
   0xb   :  { %p1321_p3 = scmp.ne.s32.totalorder %s17_s10, %s1320_s20  ;;  %p1325_p4 = scmp.lt.s32.totalorder %s17_s10, %s17_s10 }
   0xc   :  { %p1326_p5 = scmp.lt.s32.totalorder %s1324_s21, %s1320_s20 }
   0xe   :  { %p1327_p6 = por %p1326_p5, %p1325_p4 }
  0x10   :  { %p1328_p7 = pnand %p1327_p6, %p1321_p3 }
  0x12   :  { %1331 = shalt.err (!%p1328_p7)
}
  0x13   :  { %19 = dma.hbm_to_vmem [thread:$0]  %s1858_s0, 16, %s17_s10, [#allocation3]  }
  0x14   :  { %s1332_s26 = scalar_lea.hbm %s1859_s1, 128 }
  0x15   :  { %p1333_p8 = scmp.ne.s32.totalorder %s1859_s1, %s1332_s26  ;;  %p1336_p9 = scmp.lt.u32.totalorder %s1332_s26, %s1859_s1 }
  0x17   :  { %p1338_p10 = pnand %p1336_p9, %p1333_p8 }
  0x19   :  { %1341 = shalt.err (!%p1338_p10)
}
  0x1a   :  { %s1342_s3 = scalar_lea.vmem %s27_s12, 128  ;;  %p1347_p12 = scmp.lt.s32.totalorder %s27_s12, %s27_s12 }
  0x1b   :  { %p1343_p11 = scmp.ne.s32.totalorder %s27_s12, %s1342_s3  ;;  %p1348_p13 = scmp.lt.s32.totalorder %s1342_s3, %s1342_s3 }
  0x1d   :  { %p1349_p0 = por %p1348_p13, %p1347_p12 }
  0x1f   :  { %p1350_p1 = pnand %p1349_p0, %p1343_p11 }
  0x21   :  { %1353 = shalt.err (!%p1350_p1)
}
  0x22   :  { %29 = dma.hbm_to_vmem [thread:$0]  %s1859_s1, 128, %s27_s12, [#allocation6]  }
  0x23   :  { %1376 = dma.done.wait [#allocation3], 16  }
  0x24   :  { %1377 = vsyncadd [#allocation3], 4294967280 }
  0x25   :  { %1378 = dma.done.wait [#allocation6], 128  }
  0x26   :  { %1379 = vsyncadd [#allocation6], 4294967168  ;;  %v1384_v0 = vmov 0.0|0.0   ;;  %vm1385_vm0 = vmmov 0   ;;  %v1386_v1 = vmov 0.0   ;;  %v43_v2 = vlaneseq  ;;  %v112_v24 = vld [vmem:[#allocation5] sm:$0xff] }
  0x27   :  { %1147 = vmatprep.subr.bf16.mxu1 %v1384_v0  ;;  %1219 = vmatprep.subr.bf16.mxu0 %v1384_v0  ;;  %v36_v3 = vld [vmem:[#allocation2] sm:$0x1]  ;;  %v1387_v17 = vmov 1.0|1.0   ;;  %v1525_v28 = vand.u32 4294901760, %v112_v24  ;;  %s1388_s1 = smov [#allocation7]  }
  0x28   :  { %969 = vmatprep.mubr.msk.f32.mxu1 %vm1385_vm0, %v1386_v1  ;;  %1074 = vmatprep.mubr.msk.f32.mxu0 %vm1385_vm0, %v1386_v1  ;;  %v37_v4 = vmul.f32 8.0, %v36_v3  ;;  %v1434_v5 = vshrl.u32 %v43_v2, 7  ;;  %s761_s5 = sshll.u32 %s1388_s1, 4  ;;  %s762_s5 = int_to_ptr.vmem [resolvable:$true] %s761_s5 }
  0x29   :  { %v1569_v37 = vsub.f32 %v112_v24, %v1525_v28  ;;  %s1354_s6 = scalar_lea.vmem %s762_s5, 128  ;;  %p1359_p3 = scmp.lt.s32.totalorder %s762_s5, %s762_s5 }
  0x2a   :  { %v1302_v6 = vcvt.f32.s32 %v37_v4  ;;  %v62_v7 = vsub.s32 0, %v1434_v5  ;;  %v45_v9 = vadd.s32 8, %v1434_v5  ;;  %v46_v10 = vadd.s32 16, %v1434_v5  ;;  %p1355_p2 = scmp.ne.s32.totalorder %s762_s5, %s1354_s6  ;;  %p1360_p4 = scmp.lt.s32.totalorder %s1354_s6, %s1354_s6 }
  0x2b   :  { %v47_v11 = vadd.s32 24, %v1434_v5  ;;  %v48_v14 = vadd.s32 32, %v1434_v5  ;;  %v49_v15 = vadd.s32 40, %v1434_v5  ;;  %v50_v19 = vadd.s32 48, %v1434_v5 }
  0x2c   :  { %vm39_vm1 = vcmp.gt.s32.totalorder %v1302_v6, 0  ;;  %v51_v20 = vadd.s32 56, %v1434_v5  ;;  %v1497_v22 = vadd.s32 64, %v1434_v5  ;;  %v1500_v23 = vadd.s32 72, %v1434_v5  ;;  %p1361_p5 = por %p1360_p4, %p1359_p3 }
  0x2d   :  { %v40_v8 = vsel %vm39_vm1, %v1302_v6, 0  ;;  %v1532_v29 = vadd.s32 80, %v1434_v5  ;;  %v1535_v30 = vadd.s32 88, %v1434_v5  ;;  %v1566_v36 = vadd.s32 96, %v1434_v5 }
  0x2e   :  { %vm41_vm2 = vcmp.lt.s32.totalorder %v40_v8, 8  ;;  %v1579_v39 = vadd.s32 104, %v1434_v5  ;;  %v196_v47 = vand.u32 4294901760, %v1569_v37  ;;  %v1616_v48 = vadd.s32 112, %v1434_v5  ;;  %p1362_p6 = pnand %p1361_p5, %p1355_p2 }
  0x2f   :  { %v42_v12 = vsel %vm41_vm2, %v40_v8, 8  ;;  %v1619_v49 = vadd.s32 120, %v1434_v5 }
  0x30   :  { %v1440_v13 = vrot.slane %v42_v12, %v62_v7  ;;  %v197_v59 = vsub.f32 %v1569_v37, %v196_v47 }
  0x32   :  { %vm64_vm3 = vcmp.eq.s32.totalorder %v1434_v5, %v1440_v13  ;;  %vm65_vm4 = vcmp.eq.s32.totalorder %v45_v9, %v1440_v13  ;;  %vm66_vm5 = vcmp.eq.s32.totalorder %v46_v10, %v1440_v13  ;;  %vm67_vm6 = vcmp.eq.s32.totalorder %v47_v11, %v1440_v13 }
  0x33   :  { %vm1454_vm7 = vmpackc.low %vm65_vm4, %vm64_vm3  ;;  %vm68_vm9 = vcmp.eq.s32.totalorder %v48_v14, %v1440_v13  ;;  %vm69_vm10 = vcmp.eq.s32.totalorder %v49_v15, %v1440_v13  ;;  %vm70_vm12 = vcmp.eq.s32.totalorder %v50_v19, %v1440_v13  ;;  %vm71_vm13 = vcmp.eq.s32.totalorder %v51_v20, %v1440_v13 }
  0x34   :  { %1149 = vmatpush3.bf16.msk.msra.mxu1 %vm1454_vm7, %v1387_v17  ;;  %1221 = vmatpush3.bf16.msk.msra.mxu0 %vm1454_vm7, %v1387_v17  ;;  %vm1470_vm8 = vmpackc.low %vm67_vm6, %vm66_vm5  ;;  %v771_v25 = vsel %vm64_vm3, 1.0, %v1386_v1  ;;  %v772_v26 = vsel %vm65_vm4, 1.0, %v1386_v1  ;;  %vm72_vm15 = vcmp.eq.s32.totalorder %v1497_v22, %v1440_v13  ;;  %vm73_vm1 = vcmp.eq.s32.totalorder %v1500_v23, %v1440_v13 }
  0x35   :  { %1150 = vmatprep.subr.bf16.mxu1 %v1384_v0  ;;  %1222 = vmatprep.subr.bf16.mxu0 %v1384_v0  ;;  %vm1490_vm11 = vmpackc.low %vm69_vm10, %vm68_vm9  ;;  %v1537_v31 = vsub.f32 %v771_v25, %v771_v25  ;;  %v1539_v32 = vsub.f32 %v772_v26, %v772_v26  ;;  %v773_v33 = vsel %vm66_vm5, 1.0, %v1386_v1  ;;  %v774_v34 = vsel %vm67_vm6, 1.0, %v1386_v1 }
  0x36   :  { %vm1521_vm14 = vmpackc.low %vm71_vm13, %vm70_vm12  ;;  %v775_v38 = vsel %vm68_vm9, 1.0, %v1386_v1  ;;  %vm74_vm3 = vcmp.eq.s32.totalorder %v1532_v29, %v1440_v13  ;;  %vm75_vm4 = vcmp.eq.s32.totalorder %v1535_v30, %v1440_v13  ;;  %v1583_v42 = vsub.f32 %v773_v33, %v773_v33 }
  0x37   :  { %vm1561_vm2 = vmpackc.low %vm73_vm1, %vm72_vm15  ;;  %v207_v40 = vand.u32 4294901760, %v1537_v31  ;;  %v214_v41 = vand.u32 4294901760, %v1539_v32  ;;  %v1585_v43 = vsub.f32 %v774_v34, %v774_v34  ;;  %v776_v44 = vsel %vm69_vm10, 1.0, %v1386_v1 }
  0x38   :  { %1152 = vmatpush3.bf16.msk.msra.mxu1 %vm1470_vm8, %v1387_v17  ;;  %1224 = vmatpush3.bf16.msk.msra.mxu0 %vm1470_vm8, %v1387_v17  ;;  %v1596_v45 = vsub.f32 %v775_v38, %v775_v38  ;;  %vm1606_vm5 = vmpackc.low %vm75_vm4, %vm74_vm3  ;;  %vm76_vm6 = vcmp.eq.s32.totalorder %v1566_v36, %v1440_v13  ;;  %vm77_vm9 = vcmp.eq.s32.totalorder %v1579_v39, %v1440_v13  ;;  %v777_v52 = vsel %vm70_vm12, 1.0, %v1386_v1 }
  0x39   :  { %1153 = vmatprep.subr.bf16.mxu1 %v1384_v0  ;;  %1225 = vmatprep.subr.bf16.mxu0 %v1384_v0  ;;  %v208_v50 = vsub.f32 %v1537_v31, %v207_v40  ;;  %v215_v51 = vsub.f32 %v1539_v32, %v214_v41  ;;  %v778_v53 = vsel %vm71_vm13, 1.0, %v1386_v1  ;;  %v221_v54 = vand.u32 4294901760, %v1583_v42  ;;  %vm1648_vm10 = vmpackc.low %vm77_vm9, %vm76_vm6 }
  0x3a   :  { %v228_v55 = vand.u32 4294901760, %v1585_v43  ;;  %v1631_v56 = vsub.f32 %v776_v44, %v776_v44  ;;  %v235_v57 = vand.u32 4294901760, %v1596_v45  ;;  %v1653_v60 = vsub.f32 %v777_v52, %v777_v52 }
  0x3b   :  { %v1655_v61 = vsub.f32 %v778_v53, %v778_v53  ;;  %vm78_vm12 = vcmp.eq.s32.totalorder %v1616_v48, %v1440_v13  ;;  %vm79_vm13 = vcmp.eq.s32.totalorder %v1619_v49, %v1440_v13  ;;  %v209_v62 = vand.u32 4294901760, %v208_v50 }
  0x3c   :  { %1155 = vmatpush3.bf16.msk.msra.mxu1 %vm1490_vm11, %v1387_v17  ;;  %1227 = vmatpush3.bf16.msk.msra.mxu0 %vm1490_vm11, %v1387_v17  ;;  %v216_v63 = vand.u32 4294901760, %v215_v51  ;;  %v779_v2 = vsel %vm72_vm15, 1.0, %v1386_v1  ;;  %v780_v3 = vsel %vm73_vm1, 1.0, %v1386_v1  ;;  %v242_v4 = vand.u32 4294901760, %v1631_v56  ;;  %vm1686_vm15 = vmpackc.low %vm79_vm13, %vm78_vm12 }
  0x3d   :  { %1156 = vmatprep.subr.bf16.mxu1 %v1384_v0  ;;  %1228 = vmatprep.subr.bf16.mxu0 %v1384_v0  ;;  %v222_v5 = vsub.f32 %v1583_v42, %v221_v54  ;;  %v229_v6 = vsub.f32 %v1585_v43, %v228_v55  ;;  %v198_v8 = vand.u32 4294901760, %v197_v59  ;;  %v249_v9 = vand.u32 4294901760, %v1653_v60 }
  0x3e   :  { %v256_v10 = vand.u32 4294901760, %v1655_v61  ;;  %v1692_v11 = vsub.f32 %v779_v2, %v779_v2  ;;  %v1694_v12 = vsub.f32 %v780_v3, %v780_v3  ;;  %v781_v14 = vsel %vm74_vm3, 1.0, %v1386_v1 }
  0x3f   :  { %v782_v15 = vsel %vm75_vm4, 1.0, %v1386_v1  ;;  %v1172_v19 = vpack.c.bf16 %v216_v63, %v209_v62  ;;  %v236_v20 = vsub.f32 %v1596_v45, %v235_v57  ;;  %v1244_v22 = vpack.c.bf16 %v214_v41, %v207_v40 }
  0x40   :  { %1158 = vmatpush3.bf16.msk.msra.mxu1 %vm1521_vm14, %v1387_v17  ;;  %1230 = vmatpush3.bf16.msk.msra.mxu0 %vm1521_vm14, %v1387_v17  ;;  %v223_v23 = vand.u32 4294901760, %v222_v5  ;;  %v230_v24 = vand.u32 4294901760, %v229_v6  ;;  %v243_v25 = vsub.f32 %v1631_v56, %v242_v4  ;;  %v263_v26 = vand.u32 4294901760, %v1692_v11 }
  0x41   :  { %1159 = vmatprep.subr.bf16.mxu1 %v1384_v0  ;;  %1231 = vmatprep.subr.bf16.mxu0 %v1384_v0  ;;  %v270_v29 = vand.u32 4294901760, %v1694_v12  ;;  %v1718_v30 = vsub.f32 %v781_v14, %v781_v14  ;;  %v1720_v33 = vsub.f32 %v782_v15, %v782_v15  ;;  %v783_v34 = vsel %vm76_vm6, 1.0, %v1386_v1 }
  0x42   :  { %v784_v38 = vsel %vm77_vm9, 1.0, %v1386_v1  ;;  %v1247_v40 = vpack.c.bf16 %v228_v55, %v221_v54  ;;  %v237_v41 = vand.u32 4294901760, %v236_v20  ;;  %v1175_v44 = vpack.c.bf16 %v230_v24, %v223_v23 }
  0x43   :  { %v244_v50 = vand.u32 4294901760, %v243_v25  ;;  %v250_v51 = vsub.f32 %v1653_v60, %v249_v9  ;;  %v257_v52 = vsub.f32 %v1655_v61, %v256_v10  ;;  %v277_v36 = vand.u32 4294901760, %v1718_v30 }
  0x44   :  { %1161 = vmatpush3.bf16.msk.msra.mxu1 %vm1561_vm2, %v1387_v17  ;;  %1233 = vmatpush3.bf16.msk.msra.mxu0 %vm1561_vm2, %v1387_v17  ;;  %v284_v39 = vand.u32 4294901760, %v1720_v33  ;;  %v1736_v53 = vsub.f32 %v783_v34, %v783_v34  ;;  %v785_v54 = vsel %vm78_vm12, 1.0, %v1386_v1  ;;  %v786_v55 = vsel %vm79_vm13, 1.0, %v1386_v1 }
  0x45   :  { %1162 = vmatprep.subr.bf16.mxu1 %v1384_v0  ;;  %1234 = vmatprep.subr.bf16.mxu0 %v1384_v0  ;;  %v1250_v59 = vpack.c.bf16 %v242_v4, %v235_v57  ;;  %v264_v62 = vsub.f32 %v1692_v11, %v263_v26  ;;  %v1178_v63 = vpack.c.bf16 %v244_v50, %v237_v41  ;;  %v251_v2 = vand.u32 4294901760, %v250_v51 }
  0x46   :  { %v258_v3 = vand.u32 4294901760, %v257_v52  ;;  %v271_v5 = vsub.f32 %v1694_v12, %v270_v29  ;;  %v291_v48 = vand.u32 4294901760, %v1736_v53  ;;  %v1759_v13 = vsub.f32 %v785_v54, %v785_v54 }
  0x47   :  { %v1762_v57 = vsub.f32 %v786_v55, %v786_v55  ;;  %v1253_v4 = vpack.c.bf16 %v256_v10, %v249_v9  ;;  %v265_v6 = vand.u32 4294901760, %v264_v62  ;;  %v278_v15 = vsub.f32 %v1718_v30, %v277_v36 }
  0x48   :  { %1164 = vmatpush3.bf16.msk.msra.mxu1 %vm1606_vm5, %v1387_v17  ;;  %1236 = vmatpush3.bf16.msk.msra.mxu0 %vm1606_vm5, %v1387_v17  ;;  %v272_v14 = vand.u32 4294901760, %v271_v5  ;;  %v305_v20 = vand.u32 4294901760, %v1759_v13  ;;  %v1256_v23 = vpack.c.bf16 %v270_v29, %v263_v26  ;;  %v292_v9 = vsub.f32 %v1736_v53, %v291_v48 }
  0x49   :  { %1165 = vmatprep.subr.bf16.mxu1 %v1384_v0  ;;  %1237 = vmatprep.subr.bf16.mxu0 %v1384_v0  ;;  %v279_v24 = vand.u32 4294901760, %v278_v15  ;;  %v1196_v55 = vpack.c.bf16 %v1539_v32, %v1537_v31  ;;  %v1202_v16 = vpack.c.bf16 %v1631_v56, %v1596_v45  ;;  %v1208_v18 = vpack.c.bf16 %v1694_v12, %v1692_v11 }
  0x4a   :  { %v1184_v10 = vpack.c.bf16 %v272_v14, %v265_v6  ;;  %v306_v26 = vsub.f32 %v1759_v13, %v305_v20  ;;  %v1211_v21 = vpack.c.bf16 %v1720_v33, %v1718_v30  ;;  %v1217_v31 = vpack.c.bf16 %v1762_v57, %v1759_v13 }
  0x4c   :  { %1167 = vmatpush3.bf16.msk.msra.mxu1 %vm1648_vm10, %v1387_v17  ;;  %1239 = vmatpush3.bf16.msk.msra.mxu0 %vm1648_vm10, %v1387_v17  ;;  %v307_v52 = vand.u32 4294901760, %v306_v26 }
  0x4d   :  { %1168 = vmatprep.subr.bf16.mxu1 %v1384_v0  ;;  %1240 = vmatprep.subr.bf16.mxu0 %v1384_v0 }
  0x50   :  { %1170 = vmatpush3.bf16.msk.msra.mxu1 %vm1686_vm15, %v1387_v17  ;;  %1242 = vmatpush3.bf16.msk.msra.mxu0 %vm1686_vm15, %v1387_v17 }
  0x51   :  { %1171 = vmatprep.subr.bf16.mxu1 %v1384_v0  ;;  %1243 = vmatprep.subr.bf16.mxu0 %v1384_v0 }
  0x53   :  { %970 = vmatmul.mubr.f32.vlgmr.msra.gmra.mrb[0].mxu1 %v198_v8  ;;  %1075 = vmatmul.mubr.f32.vlgmr.msra.gmra.mrb[0].mxu0 %v196_v47  ;;  %v1738_v47 = vsub.f32 %v784_v38, %v784_v38  ;;  %v1181_v8 = vpack.c.bf16 %v258_v3, %v251_v2  ;;  %v1259_v38 = vpack.c.bf16 %v284_v39, %v277_v36 }
  0x54   :  { %1173 = vmatpush3.bf16.msra.mxu1 %v1172_v19  ;;  %1245 = vmatpush3.bf16.msra.mxu0 %v1244_v22  ;;  %v285_v19 = vsub.f32 %v1720_v33, %v284_v39  ;;  %v312_v22 = vand.u32 4294901760, %v1762_v57 }
  0x55   :  { %1174 = vmatprep.subr.bf16.mxu1 %v1384_v0  ;;  %1246 = vmatprep.subr.bf16.mxu0 %v1384_v0  ;;  %v298_v49 = vand.u32 4294901760, %v1738_v47  ;;  %v1214_v27 = vpack.c.bf16 %v1738_v47, %v1736_v53 }
  0x56   :  { %1004 = vmatprep.mubr.msk.f32.mxu1 %vm1385_vm0, %v1386_v1  ;;  %1109 = vmatprep.mubr.msk.f32.mxu0 %vm1385_vm0, %v1386_v1  ;;  %v286_v25 = vand.u32 4294901760, %v285_v19  ;;  %v313_v29 = vsub.f32 %v1762_v57, %v312_v22  ;;  %v1265_v39 = vpack.c.bf16 %v312_v22, %v305_v20 }
  0x57   :  { %v299_v34 = vsub.f32 %v1738_v47, %v298_v49  ;;  %v1262_v51 = vpack.c.bf16 %v298_v49, %v291_v48 }
  0x58   :  { %1176 = vmatpush3.bf16.msra.mxu1 %v1175_v44  ;;  %1248 = vmatpush3.bf16.msra.mxu0 %v1247_v40  ;;  %v293_v40 = vand.u32 4294901760, %v292_v9  ;;  %v1187_v41 = vpack.c.bf16 %v286_v25, %v279_v24  ;;  %v314_v54 = vand.u32 4294901760, %v313_v29 }
  0x59   :  { %1177 = vmatprep.subr.bf16.mxu1 %v1384_v0  ;;  %1249 = vmatprep.subr.bf16.mxu0 %v1384_v0  ;;  %v300_v44 = vand.u32 4294901760, %v299_v34 }
  0x5a   :  { %v1193_v36 = vpack.c.bf16 %v314_v54, %v307_v52 }
  0x5b   :  { %v1190_v50 = vpack.c.bf16 %v300_v44, %v293_v40 }
  0x5c   :  { %1179 = vmatpush3.bf16.msra.mxu1 %v1178_v63  ;;  %1251 = vmatpush3.bf16.msra.mxu0 %v1250_v59  ;;  %v1199_v59 = vpack.c.bf16 %v1585_v43, %v1583_v42 }
  0x5d   :  { %1180 = vmatprep.subr.bf16.mxu1 %v1384_v0  ;;  %1252 = vmatprep.subr.bf16.mxu0 %v1384_v0 }
  0x60   :  { %1182 = vmatpush3.bf16.msra.mxu1 %v1181_v8  ;;  %1254 = vmatpush3.bf16.msra.mxu0 %v1253_v4 }
  0x61   :  { %1183 = vmatprep.subr.bf16.mxu1 %v1384_v0  ;;  %1255 = vmatprep.subr.bf16.mxu0 %v1384_v0 }
  0x64   :  { %1185 = vmatpush3.bf16.msra.mxu1 %v1184_v10  ;;  %1257 = vmatpush3.bf16.msra.mxu0 %v1256_v23 }
  0x65   :  { %1186 = vmatprep.subr.bf16.mxu1 %v1384_v0  ;;  %1258 = vmatprep.subr.bf16.mxu0 %v1384_v0 }
  0x68   :  { %1188 = vmatpush3.bf16.msra.mxu1 %v1187_v41  ;;  %1260 = vmatpush3.bf16.msra.mxu0 %v1259_v38 }
  0x69   :  { %1189 = vmatprep.subr.bf16.mxu1 %v1384_v0  ;;  %1261 = vmatprep.subr.bf16.mxu0 %v1384_v0 }
  0x6c   :  { %1191 = vmatpush3.bf16.msra.mxu1 %v1190_v50  ;;  %1263 = vmatpush3.bf16.msra.mxu0 %v1262_v51 }
  0x6d   :  { %1192 = vmatprep.subr.bf16.mxu1 %v1384_v0  ;;  %1264 = vmatprep.subr.bf16.mxu0 %v1384_v0 }
  0x70   :  { %1194 = vmatpush3.bf16.msra.mxu1 %v1193_v36  ;;  %1266 = vmatpush3.bf16.msra.mxu0 %v1265_v39 }
  0x71   :  { %1195 = vmatprep.subr.bf16.mxu1 %v1384_v0  ;;  %1267 = vmatprep.subr.bf16.mxu0 %v1384_v0 }
  0x73   :  { %1005 = vmatmul.mubr.f32.vlgmr.msra.gmra.mrb[0].mxu1 %v1525_v28  ;;  %1110 = vmatmul.mubr.f32.vlgmr.msra.gmra.mrb[0].mxu0 %v1525_v28 }
  0x74   :  { %1197 = vmatpush3.bf16.msra.mxu1 %v1196_v55  ;;  %1269 = vmatpush3.bf16.msk.msra.mxu0 %vm1454_vm7, %v1387_v17 }
  0x75   :  { %1198 = vmatprep.subr.bf16.mxu1 %v1384_v0  ;;  %1270 = vmatprep.subr.bf16.mxu0 %v1384_v0 }
  0x76   :  { %1039 = vmatprep.mubr.msk.f32.mxu1 %vm1385_vm0, %v1386_v1  ;;  %1144 = vmatprep.mubr.msk.f32.mxu0 %vm1385_vm0, %v1386_v1  ;;  %v1205_v1 = vpack.c.bf16 %v1655_v61, %v1653_v60 }
  0x78   :  { %1200 = vmatpush3.bf16.msra.mxu1 %v1199_v59  ;;  %1272 = vmatpush3.bf16.msk.msra.mxu0 %vm1470_vm8, %v1387_v17 }
  0x79   :  { %1201 = vmatprep.subr.bf16.mxu1 %v1384_v0  ;;  %1273 = vmatprep.subr.bf16.mxu0 %v1384_v0 }
  0x7c   :  { %1203 = vmatpush3.bf16.msra.mxu1 %v1202_v16  ;;  %1275 = vmatpush3.bf16.msk.msra.mxu0 %vm1490_vm11, %v1387_v17 }
  0x7d   :  { %1204 = vmatprep.subr.bf16.mxu1 %v1384_v0  ;;  %1276 = vmatprep.subr.bf16.mxu0 %v1384_v0 }
  0x80   :  { %1206 = vmatpush3.bf16.msra.mxu1 %v1205_v1  ;;  %1278 = vmatpush3.bf16.msk.msra.mxu0 %vm1521_vm14, %v1387_v17 }
  0x81   :  { %1207 = vmatprep.subr.bf16.mxu1 %v1384_v0  ;;  %1279 = vmatprep.subr.bf16.mxu0 %v1384_v0 }
  0x84   :  { %1209 = vmatpush3.bf16.msra.mxu1 %v1208_v18  ;;  %1281 = vmatpush3.bf16.msk.msra.mxu0 %vm1561_vm2, %v1387_v17 }
  0x85   :  { %1210 = vmatprep.subr.bf16.mxu1 %v1384_v0  ;;  %1282 = vmatprep.subr.bf16.mxu0 %v1384_v0 }
  0x88   :  { %1212 = vmatpush3.bf16.msra.mxu1 %v1211_v21  ;;  %1284 = vmatpush3.bf16.msk.msra.mxu0 %vm1606_vm5, %v1387_v17 }
  0x89   :  { %1213 = vmatprep.subr.bf16.mxu1 %v1384_v0  ;;  %1285 = vmatprep.subr.bf16.mxu0 %v1384_v0 }
  0x8c   :  { %1215 = vmatpush3.bf16.msra.mxu1 %v1214_v27  ;;  %1287 = vmatpush3.bf16.msk.msra.mxu0 %vm1648_vm10, %v1387_v17 }
  0x8d   :  { %1216 = vmatprep.subr.bf16.mxu1 %v1384_v0  ;;  %1288 = vmatprep.subr.bf16.mxu0 %v1384_v0 }
  0x90   :  { %1218 = vmatpush3.bf16.msra.mxu1 %v1217_v31  ;;  %1290 = vmatpush3.bf16.msk.msra.mxu0 %vm1686_vm15, %v1387_v17 }
  0x93   :  { %1040 = vmatmul.mubr.f32.vlgmr.msra.gmra.mrb[0].mxu1 %v1569_v37  ;;  %1145 = vmatmul.mubr.f32.vlgmr.msra.gmra.mrb[0].mxu0 %v1525_v28 }
 0x166   :  { %v455_v32 = vpop.f32.mrb[0].mxu1  ;;  %v750_v35 = vpop.f32.mrb[0].mxu0 }
 0x167   :  { %v1291_v42 = vadd.f32 %v750_v35, %v455_v32  ;;  %v1041_v43 = vpop.f32.mrb[1].mxu1  ;;  %v1146_v45 = vpop.f32.mrb[1].mxu0 }
 0x169   :  { %754 = vst [vmem:[#allocation7] sm:$0xff] %v1291_v42 }
 0x16a   :  { %1365 = shalt.err (!%p1362_p6)
}
 0x16b   :  { %s1366_s9 = scalar_lea.hbm %s1860_s2, 128 }
 0x16c   :  { %p1367_p7 = scmp.ne.s32.totalorder %s1860_s2, %s1366_s9  ;;  %p1370_p8 = scmp.lt.u32.totalorder %s1366_s9, %s1860_s2 }
 0x16e   :  { %p1372_p9 = pnand %p1370_p8, %p1367_p7 }
 0x170   :  { %1375 = shalt.err (!%p1372_p9)
}
 0x171   :  { %764 = dma.vmem_to_hbm [thread:$0]  %s762_s5, 128, %s1860_s2, [#allocation4]  }
 0x172   :  { %1380 = dma.done.wait [#allocation4], 128  }
 0x173   :  { %1381 = vsyncadd [#allocation4], 4294967168 }
 0x174   :  { %768 = vsyncpa [#allocation3], 1 }
 0x175   :  { %769 = vsyncpa [#allocation6], 1 }
 0x176   :  { %770 = vsyncpa [#allocation4], 1 }

</bundles_post_ra>
